<compile_context>
chip_gen: v6e
topology: v6e:2x2x1
jax: 0.10.0
libtpu: 0.0.40
codegen_flags: <defaults>
</compile_context>

<pallas_src>
import math

import jax
import jax.numpy as jnp
import numpy as np
from jax import lax
from jax.experimental import pallas as pl
from jax.experimental.pallas import tpu as pltpu

# ---- static "config" (mirrors CausalSelfAttention.__init__) ----
N_EMBD = 64
N_HEAD = 4
N_KV_HEADS = 2
HEAD_DIM = N_EMBD // N_HEAD                       # 16
N_REP = N_HEAD // N_KV_HEADS                      # 2
KV_DIM = N_KV_HEADS * HEAD_DIM                    # 32
QKV_DIM = (N_HEAD + 2 * N_KV_HEADS) * HEAD_DIM    # 128  (torch Wqkv output width)
QK_DIM = 2 * N_EMBD                               # 128  (q heads | repeated k heads)
XQKV_DIM = QK_DIM + KV_DIM                        # 160  (expanded Wqkv output width)
CLIP_QKV = 8.0                                    # config.clip_qkv
RMS_EPS = float(np.finfo(np.float32).eps)         # torch F.rms_norm default eps (f32)
SM_SCALE = 1.0 / math.sqrt(HEAD_DIM)
NEG_INF = -1e30


def _attn_kernel(x_ref, wqkv_ref, wproj_ref, qkb_ref, scale_ref, cos_ref, sin_ref,
                 rot_ref, hmean_ref, o_ref):
    """One batch tile per grid step: fused QKV + RoPE + qk-norm + causal SDPA + proj."""
    Bt, S, E = x_ref.shape
    M = Bt * S
    D = HEAD_DIM

    # ---- fused QKV projection; GQA K-repeat already folded into the weights ----
    x2 = x_ref[...].reshape(M, E)                                       # bf16 (cast in wrapper)
    qkv = jnp.dot(x2, wqkv_ref[...], preferred_element_type=jnp.float32)
    qkv = jnp.clip(qkv, -CLIP_QKV, CLIP_QKV)                            # (M, 160) f32

    # aligned lane-tile slices: [q | k_rep] = lanes 0:128, v = lanes 128:160
    qk = qkv[:, :QK_DIM] + qkb_ref[...]                                 # (M, 128) + per-query-head bias
    v = qkv[:, QK_DIM:]                                                 # (M, 32)  kv-head V

    # ---- RoPE on the whole q|k slab: block-diag pair rotation (exact +-1 -> bf16 MXU) ----
    rot_qk = jnp.dot(qk.astype(jnp.bfloat16), rot_ref[...],
                     preferred_element_type=jnp.float32)                # (M, 128)
    cos = cos_ref[...][None]                                            # (1, S, 128) bcast over Bt
    sin = sin_ref[...][None]
    qk = (qk.reshape(Bt, S, QK_DIM) * cos
          + rot_qk.reshape(Bt, S, QK_DIM) * sin).reshape(M, QK_DIM)

    # ---- per-head RMS norm via block-diag mean matmul (f32 operands for accuracy);
    #      softmax scale folded into the q half via scale_ref ----
    ms = jnp.dot(qk * qk, hmean_ref[...], preferred_element_type=jnp.float32)
    qk = qk * lax.rsqrt(ms + RMS_EPS) * scale_ref[...]

    # ---- causal SDPA: one Bt-batched dot_general pair per head (no G-axis concat) ----
    qk3 = qk.reshape(Bt, S, QK_DIM)
    v3 = v.reshape(Bt, S, KV_DIM)
    row = lax.broadcasted_iota(jnp.int32, (S, S), 0)
    col = lax.broadcasted_iota(jnp.int32, (S, S), 1)
    causal = (col <= row)[None]                                         # (1, S, S)

    y_heads = []
    for h in range(N_HEAD):
        qh = qk3[..., h * D:(h + 1) * D].astype(jnp.bfloat16)               # (Bt, S, 16)
        kh = qk3[..., E + h * D:E + (h + 1) * D].astype(jnp.bfloat16)
        vh = v3[..., (h // N_REP) * D:((h // N_REP) + 1) * D].astype(jnp.bfloat16)
        s = jnp.einsum('bqd,bkd->bqk', qh, kh,
                       preferred_element_type=jnp.float32)                  # (Bt, S, S)
        s = jnp.where(causal, s, NEG_INF)
        s = s - jnp.max(s, axis=-1, keepdims=True)
        p = jnp.exp(s)
        p = p * pl.reciprocal(jnp.sum(p, axis=-1, keepdims=True), approx=False)
        y_heads.append(jnp.einsum('bqk,bkd->bqd', p.astype(jnp.bfloat16), vh,
                                  preferred_element_type=jnp.float32))      # (Bt, S, 16)

    # ---- single (M, 64) @ (64, 64) output projection (no per-head K=16 loop) ----
    y = jnp.concatenate(y_heads, axis=-1).reshape(M, E).astype(jnp.bfloat16)
    out = jnp.dot(y, wproj_ref[...], preferred_element_type=jnp.float32)
    o_ref[...] = out.reshape(Bt, S, E).astype(o_ref.dtype)


def _pick_batch_tile(B, S, rows_target):
    bt = max(1, min(B, rows_target // max(S, 1)))
    if B >= 2:
        bt = min(bt, B // 2)      # keep grid extent >= 2 so both v7x TensorCores get work
    while B % bt:
        bt -= 1
    return bt


def _vmem_limit_bytes(bt, S):
    """Rough per-step footprint (double-buffered blocks + resident intermediates) + headroom."""
    M = bt * S
    blocks = 2 * (M * N_EMBD * 2) + 2 * (M * N_EMBD * 4)                # x bf16 + out f32, 2-buffered
    consts = 2 * ((N_EMBD * XQKV_DIM + N_EMBD * N_EMBD + QK_DIM * QK_DIM) * 2
                  + (QK_DIM * QK_DIM + 2 * S * QK_DIM + 2 * QK_DIM) * 4)
    inter = (M * XQKV_DIM * 4 + 4 * M * QK_DIM * 4 + M * KV_DIM * 4
             + 3 * bt * S * S * 4 + 2 * M * N_EMBD * 4)
    est = blocks + consts + inter
    return int(min(64 * 1024 * 1024, max(32 * 1024 * 1024, 2 * est)))


def causal_self_attention(x, wqkv, wproj, qk_bias, freqs_cis, *, rows_target=2048):
    """x: (B,S,E); wqkv: (E,QKV_DIM); wproj: (E,E); qk_bias: (2,1,H,D);
    freqs_cis: (S,1,D//2,2) with [...,0]=cos, [...,1]=sin."""
    B, S, E = x.shape
    D = HEAD_DIM

    bt = _pick_batch_tile(B, S, rows_target)

    # ---- fold the GQA repeat_interleave of K into Wqkv (clip is elementwise -> exact) ----
    wq = wqkv[:, :E]
    wk = wqkv[:, E:E + KV_DIM]
    wv = wqkv[:, E + KV_DIM:]
    wk_rep = jnp.concatenate(
        [wk[:, (h // N_REP) * D:((h // N_REP) + 1) * D] for h in range(N_HEAD)], axis=1)
    wqkv_x = jnp.concatenate([wq, wk_rep, wv], axis=1).astype(jnp.bfloat16)      # (E, 160)
    wproj_b = wproj.astype(jnp.bfloat16)

    # per-query-head q|k bias (applied after clip, before RoPE) -> (1, 128)
    qkbias = jnp.concatenate([qk_bias[0, 0].reshape(1, E),
                              qk_bias[1, 0].reshape(1, E)], axis=1).astype(jnp.float32)

    # interleaved cos/sin per head, tiled across the 8 (4 q + 4 k) head blocks -> (S, 128)
    cos = jnp.repeat(freqs_cis[:, 0, :, 0], 2, axis=-1)                          # (S, D)
    sin = jnp.repeat(freqs_cis[:, 0, :, 1], 2, axis=-1)
    cos_s = jnp.tile(cos, (1, QK_DIM // D)).astype(jnp.float32)                  # (S, 128)
    sin_s = jnp.tile(sin, (1, QK_DIM // D)).astype(jnp.float32)

    # block-diagonal pair-rotation (exact +-1 in bf16) and per-head-mean (f32) matrices
    rot16 = np.zeros((D, D), np.float32)
    for i in range(D // 2):
        rot16[2 * i + 1, 2 * i] = -1.0    # out[2i]   = -x[2i+1]
        rot16[2 * i, 2 * i + 1] = 1.0     # out[2i+1] =  x[2i]
    nblk = QK_DIM // D                                                            # 8
    rot = jnp.asarray(np.kron(np.eye(nblk, dtype=np.float32), rot16)).astype(jnp.bfloat16)
    hmean = jnp.asarray(np.kron(np.eye(nblk, dtype=np.float32),
                                np.full((D, D), 1.0 / D, np.float32)))            # (128,128) f32

    # softmax scale folded into the q half (post-norm multiply)
    scale = jnp.concatenate([jnp.full((1, E), SM_SCALE, jnp.float32),
                             jnp.ones((1, E), jnp.float32)], axis=1)              # (1, 128)

    x_b = x.astype(jnp.bfloat16)    # bf16 HBM stream; all accumulation stays f32 in-kernel

    return pl.pallas_call(
        _attn_kernel,
        out_shape=jax.ShapeDtypeStruct((B, S, E), x.dtype),
        grid_spec=pltpu.PrefetchScalarGridSpec(
            num_scalar_prefetch=0,
            grid=(B // bt,),
            in_specs=[
                pl.BlockSpec((bt, S, E), lambda b: (b, 0, 0)),                    # x (bf16)
                pl.BlockSpec((E, XQKV_DIM), lambda b: (0, 0)),                    # Wqkv expanded (bf16)
                pl.BlockSpec((E, E), lambda b: (0, 0)),                           # Wproj (bf16)
                pl.BlockSpec((1, QK_DIM), lambda b: (0, 0)),                      # q|k bias
                pl.BlockSpec((1, QK_DIM), lambda b: (0, 0)),                      # softmax-scale vector
                pl.BlockSpec((S, QK_DIM), lambda b: (0, 0)),                      # cos (per position)
                pl.BlockSpec((S, QK_DIM), lambda b: (0, 0)),                      # sin (per position)
                pl.BlockSpec((QK_DIM, QK_DIM), lambda b: (0, 0)),                 # block-diag rot (bf16)
                pl.BlockSpec((QK_DIM, QK_DIM), lambda b: (0, 0)),                 # block-diag mean (f32)
            ],
            out_specs=pl.BlockSpec((bt, S, E), lambda b: (b, 0, 0)),
        ),
        compiler_params=pltpu.CompilerParams(
            dimension_semantics=("parallel",),
            vmem_limit_bytes=_vmem_limit_bytes(bt, S)),
    )(x_b, wqkv_x, wproj_b, qkbias, scale, cos_s, sin_s, rot, hmean)


# ---- pure-JAX reference mirroring the torch forward (for validation) ----
def reference(x, wqkv, wproj, qk_bias, freqs_cis):
    B, S, E = x.shape
    qkv = jnp.clip(x @ wqkv, -CLIP_QKV, CLIP_QKV)
    q, k, v = jnp.split(qkv, [E, E + KV_DIM], axis=2)
    q = q.reshape(B, S, N_HEAD, HEAD_DIM)
    k = jnp.repeat(k.reshape(B, S, N_KV_HEADS, HEAD_DIM), N_REP, axis=2)
    v = jnp.repeat(v.reshape(B, S, N_KV_HEADS, HEAD_DIM), N_REP, axis=2)
    q = q + qk_bias[0]
    k = k + qk_bias[1]

    def rope(t):
        tr = t.reshape(B, S, N_HEAD, HEAD_DIM // 2, 2)
        c = freqs_cis[None, :, :, :, 0]
        s = freqs_cis[None, :, :, :, 1]
        r0 = tr[..., 0] * c - tr[..., 1] * s
        r1 = tr[..., 1] * c + tr[..., 0] * s
        return jnp.stack([r0, r1], -1).reshape(B, S, N_HEAD, HEAD_DIM)

    q, k = rope(q), rope(k)
    q = q * lax.rsqrt(jnp.mean(q * q, axis=-1, keepdims=True) + RMS_EPS)
    k = k * lax.rsqrt(jnp.mean(k * k, axis=-1, keepdims=True) + RMS_EPS)
    s = jnp.einsum('bqhd,bkhd->bhqk', q, k) * SM_SCALE
    causal = jnp.tril(jnp.ones((S, S), bool))
    s = jnp.where(causal[None, None], s, NEG_INF)
    p = jax.nn.softmax(s, axis=-1)
    y = jnp.einsum('bhqk,bkhd->bqhd', p, v).reshape(B, S, E)
    return y @ wproj


if __name__ == "__main__":
    B, S = 2, 8
    key = jax.random.PRNGKey(0)
    kx, kw1, kw2 = jax.random.split(key, 3)

    x = jax.random.normal(kx, (B, S, N_EMBD), jnp.float32)
    wqkv = jax.random.normal(kw1, (N_EMBD, QKV_DIM), jnp.float32) / math.sqrt(N_EMBD)
    wproj = jax.random.normal(kw2, (N_EMBD, N_EMBD), jnp.float32) / math.sqrt(N_EMBD)
    qk_bias = jnp.zeros((2, 1, N_HEAD, HEAD_DIM), jnp.float32)   # matches torch.zeros init

    # rotary table: freqs_cis (S, 1, HEAD_DIM//2, 2) with [...,0]=cos, [...,1]=sin
    pos = jnp.arange(S, dtype=jnp.float32)[:, None]
    inv_freq = 1.0 / (10000.0 ** (jnp.arange(0, HEAD_DIM, 2, dtype=jnp.float32) / HEAD_DIM))
    ang = pos * inv_freq[None, :]
    freqs_cis = jnp.stack([jnp.cos(ang), jnp.sin(ang)], axis=-1)[:, None]   # (S,1,8,2)

    out = causal_self_attention(x, wqkv, wproj, qk_bias, freqs_cis)
    out = jax.block_until_ready(out)

    ref = reference(x, wqkv, wproj, qk_bias, freqs_cis)
    # bf16 MXU operands (x, Wqkv, RoPE rotation, scores, PV, proj) bound the absolute error
    # at ~1-2% of the output magnitude; 5e-2 keeps >1.5x margin over the observed worst case
    # while a semantic bug (wrong bias/RoPE/mask/repeat) would still fail by a wide margin.
    np.testing.assert_allclose(np.asarray(out), np.asarray(ref), rtol=5e-2, atol=5e-2)
    print("KERNEL_OK")
</pallas_src>

<mosaic_0001>
module attributes {stable_mosaic.version = 11 : i64} {
  func.func @_attn_kernel(%arg0: i32, %arg1: memref<1x8x64xbf16, #tpu.memory_space<vmem>>, %arg2: memref<64x160xbf16, #tpu.memory_space<vmem>>, %arg3: memref<64x64xbf16, #tpu.memory_space<vmem>>, %arg4: memref<1x128xf32, #tpu.memory_space<vmem>>, %arg5: memref<1x128xf32, #tpu.memory_space<vmem>>, %arg6: memref<8x128xf32, #tpu.memory_space<vmem>>, %arg7: memref<8x128xf32, #tpu.memory_space<vmem>>, %arg8: memref<128x128xbf16, #tpu.memory_space<vmem>>, %arg9: memref<128x128xf32, #tpu.memory_space<vmem>>, %arg10: memref<1x8x64xf32, #tpu.memory_space<vmem>>) attributes {dimension_semantics = [#tpu.dimension_semantics<parallel>], iteration_bounds = array<i64: 2>, scalar_prefetch = 0 : i64, scratch_operands = 0 : i64, tpu.core_type = #tpu.core_type<tc>, window_params = [{transform_indices = @transform_0, window_bounds = array<i64: 1, 8, 64>}, {pipeline_mode = #tpu.pipeline_mode<synchronous>, transform_indices = @transform_1, window_bounds = array<i64: 64, 160>}, {pipeline_mode = #tpu.pipeline_mode<synchronous>, transform_indices = @transform_2, window_bounds = array<i64: 64, 64>}, {pipeline_mode = #tpu.pipeline_mode<synchronous>, transform_indices = @transform_3, window_bounds = array<i64: 1, 128>}, {pipeline_mode = #tpu.pipeline_mode<synchronous>, transform_indices = @transform_4, window_bounds = array<i64: 1, 128>}, {pipeline_mode = #tpu.pipeline_mode<synchronous>, transform_indices = @transform_5, window_bounds = array<i64: 8, 128>}, {pipeline_mode = #tpu.pipeline_mode<synchronous>, transform_indices = @transform_6, window_bounds = array<i64: 8, 128>}, {pipeline_mode = #tpu.pipeline_mode<synchronous>, transform_indices = @transform_7, window_bounds = array<i64: 128, 128>}, {pipeline_mode = #tpu.pipeline_mode<synchronous>, transform_indices = @transform_8, window_bounds = array<i64: 128, 128>}, {transform_indices = @transform_9, window_bounds = array<i64: 1, 8, 64>}]} {
    %c0 = arith.constant 0 : index
    %c0_0 = arith.constant 0 : index
    %c0_1 = arith.constant 0 : index
    %0 = vector.load %arg1[%c0, %c0_0, %c0_1] : memref<1x8x64xbf16, #tpu.memory_space<vmem>>, vector<1x8x64xbf16>
    %1 = vector.shape_cast %0 : vector<1x8x64xbf16> to vector<8x64xbf16>
    %c0_2 = arith.constant 0 : index
    %c0_3 = arith.constant 0 : index
    %2 = vector.load %arg2[%c0_2, %c0_3] : memref<64x160xbf16, #tpu.memory_space<vmem>>, vector<64x160xbf16>
    %cst = arith.constant dense<0.000000e+00> : vector<8x160xf32>
    %3 = tpu.matmul %1, %2, %cst {dimension_numbers = #tpu.dot_dimension_numbers<[1], [0], [0], [1], [0, 0, 1, 1], [], []>} : vector<8x64xbf16>, vector<64x160xbf16>, vector<8x160xf32> -> vector<8x160xf32>
    %cst_4 = arith.constant -8.000000e+00 : f32
    %cst_5 = arith.constant 8.000000e+00 : f32
    %4 = vector.broadcast %cst_4 : f32 to vector<8x160xf32>
    %5 = arith.maximumf %4, %3 : vector<8x160xf32>
    %6 = vector.broadcast %cst_5 : f32 to vector<8x160xf32>
    %7 = arith.minimumf %6, %5 : vector<8x160xf32>
    %8 = vector.extract_strided_slice %7 {offsets = [0, 0], sizes = [8, 128], strides = [1, 1]} : vector<8x160xf32> to vector<8x128xf32>
    %c0_6 = arith.constant 0 : index
    %c0_7 = arith.constant 0 : index
    %9 = vector.load %arg4[%c0_6, %c0_7] : memref<1x128xf32, #tpu.memory_space<vmem>>, vector<1x128xf32>
    %10 = vector.broadcast %9 : vector<1x128xf32> to vector<8x128xf32>
    %11 = arith.addf %8, %10 : vector<8x128xf32>
    %12 = vector.extract_strided_slice %7 {offsets = [0, 128], sizes = [8, 32], strides = [1, 1]} : vector<8x160xf32> to vector<8x32xf32>
    %13 = arith.truncf %11 : vector<8x128xf32> to vector<8x128xbf16>
    %c0_8 = arith.constant 0 : index
    %c0_9 = arith.constant 0 : index
    %14 = vector.load %arg8[%c0_8, %c0_9] : memref<128x128xbf16, #tpu.memory_space<vmem>>, vector<128x128xbf16>
    %cst_10 = arith.constant dense<0.000000e+00> : vector<8x128xf32>
    %15 = tpu.matmul %13, %14, %cst_10 {dimension_numbers = #tpu.dot_dimension_numbers<[1], [0], [0], [1], [0, 0, 1, 1], [], []>} : vector<8x128xbf16>, vector<128x128xbf16>, vector<8x128xf32> -> vector<8x128xf32>
    %c0_11 = arith.constant 0 : index
    %c0_12 = arith.constant 0 : index
    %16 = vector.load %arg6[%c0_11, %c0_12] : memref<8x128xf32, #tpu.memory_space<vmem>>, vector<8x128xf32>
    %17 = vector.shape_cast %16 : vector<8x128xf32> to vector<1x8x128xf32>
    %c0_13 = arith.constant 0 : index
    %c0_14 = arith.constant 0 : index
    %18 = vector.load %arg7[%c0_13, %c0_14] : memref<8x128xf32, #tpu.memory_space<vmem>>, vector<8x128xf32>
    %19 = vector.shape_cast %18 : vector<8x128xf32> to vector<1x8x128xf32>
    %20 = vector.shape_cast %11 : vector<8x128xf32> to vector<1x8x128xf32>
    %21 = arith.mulf %20, %17 : vector<1x8x128xf32>
    %22 = vector.shape_cast %15 : vector<8x128xf32> to vector<1x8x128xf32>
    %23 = arith.mulf %22, %19 : vector<1x8x128xf32>
    %24 = arith.addf %21, %23 : vector<1x8x128xf32>
    %25 = vector.shape_cast %24 : vector<1x8x128xf32> to vector<8x128xf32>
    %26 = arith.mulf %25, %25 : vector<8x128xf32>
    %c0_15 = arith.constant 0 : index
    %c0_16 = arith.constant 0 : index
    %27 = vector.load %arg9[%c0_15, %c0_16] : memref<128x128xf32, #tpu.memory_space<vmem>>, vector<128x128xf32>
    %cst_17 = arith.constant dense<0.000000e+00> : vector<8x128xf32>
    %28 = tpu.matmul %26, %27, %cst_17 {dimension_numbers = #tpu.dot_dimension_numbers<[1], [0], [0], [1], [0, 0, 1, 1], [], []>} : vector<8x128xf32>, vector<128x128xf32>, vector<8x128xf32> -> vector<8x128xf32>
    %cst_18 = arith.constant 1.1920929E-7 : f32
    %29 = vector.broadcast %cst_18 : f32 to vector<8x128xf32>
    %30 = arith.addf %28, %29 : vector<8x128xf32>
    %31 = math.rsqrt %30 : vector<8x128xf32>
    %32 = arith.mulf %25, %31 : vector<8x128xf32>
    %c0_19 = arith.constant 0 : index
    %c0_20 = arith.constant 0 : index
    %33 = vector.load %arg5[%c0_19, %c0_20] : memref<1x128xf32, #tpu.memory_space<vmem>>, vector<1x128xf32>
    %34 = vector.broadcast %33 : vector<1x128xf32> to vector<8x128xf32>
    %35 = arith.mulf %32, %34 : vector<8x128xf32>
    %36 = vector.shape_cast %35 : vector<8x128xf32> to vector<1x8x128xf32>
    %37 = vector.shape_cast %12 : vector<8x32xf32> to vector<1x8x32xf32>
    %38 = tpu.iota {dimensions = array<i32: 0>} : vector<8x8xi32>
    %39 = tpu.iota {dimensions = array<i32: 1>} : vector<8x8xi32>
    %40 = arith.cmpi sle, %39, %38 : vector<8x8xi32>
    %41 = vector.shape_cast %40 : vector<8x8xi1> to vector<1x8x8xi1>
    %42 = vector.extract_strided_slice %36 {offsets = [0, 0, 0], sizes = [1, 8, 16], strides = [1, 1, 1]} : vector<1x8x128xf32> to vector<1x8x16xf32>
    %43 = arith.truncf %42 : vector<1x8x16xf32> to vector<1x8x16xbf16>
    %44 = vector.extract_strided_slice %36 {offsets = [0, 0, 64], sizes = [1, 8, 16], strides = [1, 1, 1]} : vector<1x8x128xf32> to vector<1x8x16xf32>
    %45 = arith.truncf %44 : vector<1x8x16xf32> to vector<1x8x16xbf16>
    %46 = vector.extract_strided_slice %37 {offsets = [0, 0, 0], sizes = [1, 8, 16], strides = [1, 1, 1]} : vector<1x8x32xf32> to vector<1x8x16xf32>
    %47 = arith.truncf %46 : vector<1x8x16xf32> to vector<1x8x16xbf16>
    "tpu.trace_start"() <{level = 10 : i32, message = "bqd,bkd->bqk"}> : () -> ()
    %cst_21 = arith.constant dense<0.000000e+00> : vector<1x8x8xf32>
    %48 = tpu.matmul %43, %45, %cst_21 {dimension_numbers = #tpu.dot_dimension_numbers<[2], [2], [1], [1], [0, 0, 0, 1, 1, 1], [0], [0]>} : vector<1x8x16xbf16>, vector<1x8x16xbf16>, vector<1x8x8xf32> -> vector<1x8x8xf32>
    %cst_22 = arith.constant -1.000000e+30 : f32
    "tpu.trace_stop"() : () -> ()
    %49 = vector.broadcast %cst_22 : f32 to vector<1x8x8xf32>
    %50 = arith.select %41, %48, %49 : vector<1x8x8xi1>, vector<1x8x8xf32>
    %cst_23 = arith.constant dense<0xFF800000> : vector<1x8xf32>
    %51 = vector.multi_reduction <maximumf>, %50, %cst_23 [2] : vector<1x8x8xf32> to vector<1x8xf32>
    %52 = vector.shape_cast %51 : vector<1x8xf32> to vector<1x8x1xf32>
    %53 = vector.broadcast %52 : vector<1x8x1xf32> to vector<1x8x8xf32>
    %54 = arith.subf %50, %53 : vector<1x8x8xf32>
    %55 = math.exp %54 : vector<1x8x8xf32>
    %cst_24 = arith.constant dense<0.000000e+00> : vector<1x8xf32>
    %56 = vector.multi_reduction <add>, %55, %cst_24 [2] : vector<1x8x8xf32> to vector<1x8xf32>
    %57 = vector.shape_cast %56 : vector<1x8xf32> to vector<1x8x1xf32>
    %58 = tpu.reciprocal %57 : vector<1x8x1xf32> -> vector<1x8x1xf32>
    %59 = vector.broadcast %58 : vector<1x8x1xf32> to vector<1x8x8xf32>
    %60 = arith.mulf %55, %59 : vector<1x8x8xf32>
    %61 = arith.truncf %60 : vector<1x8x8xf32> to vector<1x8x8xbf16>
    "tpu.trace_start"() <{level = 10 : i32, message = "bqk,bkd->bqd"}> : () -> ()
    %cst_25 = arith.constant dense<0.000000e+00> : vector<1x8x16xf32>
    %62 = tpu.matmul %61, %47, %cst_25 {dimension_numbers = #tpu.dot_dimension_numbers<[2], [1], [1], [2], [0, 0, 0, 1, 1, 2], [0], [0]>} : vector<1x8x8xbf16>, vector<1x8x16xbf16>, vector<1x8x16xf32> -> vector<1x8x16xf32>
    "tpu.trace_stop"() : () -> ()
    %63 = vector.extract_strided_slice %36 {offsets = [0, 0, 16], sizes = [1, 8, 16], strides = [1, 1, 1]} : vector<1x8x128xf32> to vector<1x8x16xf32>
    %64 = arith.truncf %63 : vector<1x8x16xf32> to vector<1x8x16xbf16>
    %65 = vector.extract_strided_slice %36 {offsets = [0, 0, 80], sizes = [1, 8, 16], strides = [1, 1, 1]} : vector<1x8x128xf32> to vector<1x8x16xf32>
    %66 = arith.truncf %65 : vector<1x8x16xf32> to vector<1x8x16xbf16>
    %67 = vector.extract_strided_slice %37 {offsets = [0, 0, 0], sizes = [1, 8, 16], strides = [1, 1, 1]} : vector<1x8x32xf32> to vector<1x8x16xf32>
    %68 = arith.truncf %67 : vector<1x8x16xf32> to vector<1x8x16xbf16>
    "tpu.trace_start"() <{level = 10 : i32, message = "bqd,bkd->bqk"}> : () -> ()
    %cst_26 = arith.constant dense<0.000000e+00> : vector<1x8x8xf32>
    %69 = tpu.matmul %64, %66, %cst_26 {dimension_numbers = #tpu.dot_dimension_numbers<[2], [2], [1], [1], [0, 0, 0, 1, 1, 1], [0], [0]>} : vector<1x8x16xbf16>, vector<1x8x16xbf16>, vector<1x8x8xf32> -> vector<1x8x8xf32>
    %cst_27 = arith.constant -1.000000e+30 : f32
    "tpu.trace_stop"() : () -> ()
    %70 = vector.broadcast %cst_27 : f32 to vector<1x8x8xf32>
    %71 = arith.select %41, %69, %70 : vector<1x8x8xi1>, vector<1x8x8xf32>
    %cst_28 = arith.constant dense<0xFF800000> : vector<1x8xf32>
    %72 = vector.multi_reduction <maximumf>, %71, %cst_28 [2] : vector<1x8x8xf32> to vector<1x8xf32>
    %73 = vector.shape_cast %72 : vector<1x8xf32> to vector<1x8x1xf32>
    %74 = vector.broadcast %73 : vector<1x8x1xf32> to vector<1x8x8xf32>
    %75 = arith.subf %71, %74 : vector<1x8x8xf32>
    %76 = math.exp %75 : vector<1x8x8xf32>
    %cst_29 = arith.constant dense<0.000000e+00> : vector<1x8xf32>
    %77 = vector.multi_reduction <add>, %76, %cst_29 [2] : vector<1x8x8xf32> to vector<1x8xf32>
    %78 = vector.shape_cast %77 : vector<1x8xf32> to vector<1x8x1xf32>
    %79 = tpu.reciprocal %78 : vector<1x8x1xf32> -> vector<1x8x1xf32>
    %80 = vector.broadcast %79 : vector<1x8x1xf32> to vector<1x8x8xf32>
    %81 = arith.mulf %76, %80 : vector<1x8x8xf32>
    %82 = arith.truncf %81 : vector<1x8x8xf32> to vector<1x8x8xbf16>
    "tpu.trace_start"() <{level = 10 : i32, message = "bqk,bkd->bqd"}> : () -> ()
    %cst_30 = arith.constant dense<0.000000e+00> : vector<1x8x16xf32>
    %83 = tpu.matmul %82, %68, %cst_30 {dimension_numbers = #tpu.dot_dimension_numbers<[2], [1], [1], [2], [0, 0, 0, 1, 1, 2], [0], [0]>} : vector<1x8x8xbf16>, vector<1x8x16xbf16>, vector<1x8x16xf32> -> vector<1x8x16xf32>
    "tpu.trace_stop"() : () -> ()
    %84 = vector.extract_strided_slice %36 {offsets = [0, 0, 32], sizes = [1, 8, 16], strides = [1, 1, 1]} : vector<1x8x128xf32> to vector<1x8x16xf32>
    %85 = arith.truncf %84 : vector<1x8x16xf32> to vector<1x8x16xbf16>
    %86 = vector.extract_strided_slice %36 {offsets = [0, 0, 96], sizes = [1, 8, 16], strides = [1, 1, 1]} : vector<1x8x128xf32> to vector<1x8x16xf32>
    %87 = arith.truncf %86 : vector<1x8x16xf32> to vector<1x8x16xbf16>
    %88 = vector.extract_strided_slice %37 {offsets = [0, 0, 16], sizes = [1, 8, 16], strides = [1, 1, 1]} : vector<1x8x32xf32> to vector<1x8x16xf32>
    %89 = arith.truncf %88 : vector<1x8x16xf32> to vector<1x8x16xbf16>
    "tpu.trace_start"() <{level = 10 : i32, message = "bqd,bkd->bqk"}> : () -> ()
    %cst_31 = arith.constant dense<0.000000e+00> : vector<1x8x8xf32>
    %90 = tpu.matmul %85, %87, %cst_31 {dimension_numbers = #tpu.dot_dimension_numbers<[2], [2], [1], [1], [0, 0, 0, 1, 1, 1], [0], [0]>} : vector<1x8x16xbf16>, vector<1x8x16xbf16>, vector<1x8x8xf32> -> vector<1x8x8xf32>
    %cst_32 = arith.constant -1.000000e+30 : f32
    "tpu.trace_stop"() : () -> ()
    %91 = vector.broadcast %cst_32 : f32 to vector<1x8x8xf32>
    %92 = arith.select %41, %90, %91 : vector<1x8x8xi1>, vector<1x8x8xf32>
    %cst_33 = arith.constant dense<0xFF800000> : vector<1x8xf32>
    %93 = vector.multi_reduction <maximumf>, %92, %cst_33 [2] : vector<1x8x8xf32> to vector<1x8xf32>
    %94 = vector.shape_cast %93 : vector<1x8xf32> to vector<1x8x1xf32>
    %95 = vector.broadcast %94 : vector<1x8x1xf32> to vector<1x8x8xf32>
    %96 = arith.subf %92, %95 : vector<1x8x8xf32>
    %97 = math.exp %96 : vector<1x8x8xf32>
    %cst_34 = arith.constant dense<0.000000e+00> : vector<1x8xf32>
    %98 = vector.multi_reduction <add>, %97, %cst_34 [2] : vector<1x8x8xf32> to vector<1x8xf32>
    %99 = vector.shape_cast %98 : vector<1x8xf32> to vector<1x8x1xf32>
    %100 = tpu.reciprocal %99 : vector<1x8x1xf32> -> vector<1x8x1xf32>
    %101 = vector.broadcast %100 : vector<1x8x1xf32> to vector<1x8x8xf32>
    %102 = arith.mulf %97, %101 : vector<1x8x8xf32>
    %103 = arith.truncf %102 : vector<1x8x8xf32> to vector<1x8x8xbf16>
    "tpu.trace_start"() <{level = 10 : i32, message = "bqk,bkd->bqd"}> : () -> ()
    %cst_35 = arith.constant dense<0.000000e+00> : vector<1x8x16xf32>
    %104 = tpu.matmul %103, %89, %cst_35 {dimension_numbers = #tpu.dot_dimension_numbers<[2], [1], [1], [2], [0, 0, 0, 1, 1, 2], [0], [0]>} : vector<1x8x8xbf16>, vector<1x8x16xbf16>, vector<1x8x16xf32> -> vector<1x8x16xf32>
    "tpu.trace_stop"() : () -> ()
    %105 = vector.extract_strided_slice %36 {offsets = [0, 0, 48], sizes = [1, 8, 16], strides = [1, 1, 1]} : vector<1x8x128xf32> to vector<1x8x16xf32>
    %106 = arith.truncf %105 : vector<1x8x16xf32> to vector<1x8x16xbf16>
    %107 = vector.extract_strided_slice %36 {offsets = [0, 0, 112], sizes = [1, 8, 16], strides = [1, 1, 1]} : vector<1x8x128xf32> to vector<1x8x16xf32>
    %108 = arith.truncf %107 : vector<1x8x16xf32> to vector<1x8x16xbf16>
    %109 = vector.extract_strided_slice %37 {offsets = [0, 0, 16], sizes = [1, 8, 16], strides = [1, 1, 1]} : vector<1x8x32xf32> to vector<1x8x16xf32>
    %110 = arith.truncf %109 : vector<1x8x16xf32> to vector<1x8x16xbf16>
    "tpu.trace_start"() <{level = 10 : i32, message = "bqd,bkd->bqk"}> : () -> ()
    %cst_36 = arith.constant dense<0.000000e+00> : vector<1x8x8xf32>
    %111 = tpu.matmul %106, %108, %cst_36 {dimension_numbers = #tpu.dot_dimension_numbers<[2], [2], [1], [1], [0, 0, 0, 1, 1, 1], [0], [0]>} : vector<1x8x16xbf16>, vector<1x8x16xbf16>, vector<1x8x8xf32> -> vector<1x8x8xf32>
    %cst_37 = arith.constant -1.000000e+30 : f32
    "tpu.trace_stop"() : () -> ()
    %112 = vector.broadcast %cst_37 : f32 to vector<1x8x8xf32>
    %113 = arith.select %41, %111, %112 : vector<1x8x8xi1>, vector<1x8x8xf32>
    %cst_38 = arith.constant dense<0xFF800000> : vector<1x8xf32>
    %114 = vector.multi_reduction <maximumf>, %113, %cst_38 [2] : vector<1x8x8xf32> to vector<1x8xf32>
    %115 = vector.shape_cast %114 : vector<1x8xf32> to vector<1x8x1xf32>
    %116 = vector.broadcast %115 : vector<1x8x1xf32> to vector<1x8x8xf32>
    %117 = arith.subf %113, %116 : vector<1x8x8xf32>
    %118 = math.exp %117 : vector<1x8x8xf32>
    %cst_39 = arith.constant dense<0.000000e+00> : vector<1x8xf32>
    %119 = vector.multi_reduction <add>, %118, %cst_39 [2] : vector<1x8x8xf32> to vector<1x8xf32>
    %120 = vector.shape_cast %119 : vector<1x8xf32> to vector<1x8x1xf32>
    %121 = tpu.reciprocal %120 : vector<1x8x1xf32> -> vector<1x8x1xf32>
    %122 = vector.broadcast %121 : vector<1x8x1xf32> to vector<1x8x8xf32>
    %123 = arith.mulf %118, %122 : vector<1x8x8xf32>
    %124 = arith.truncf %123 : vector<1x8x8xf32> to vector<1x8x8xbf16>
    "tpu.trace_start"() <{level = 10 : i32, message = "bqk,bkd->bqd"}> : () -> ()
    %cst_40 = arith.constant dense<0.000000e+00> : vector<1x8x16xf32>
    %125 = tpu.matmul %124, %110, %cst_40 {dimension_numbers = #tpu.dot_dimension_numbers<[2], [1], [1], [2], [0, 0, 0, 1, 1, 2], [0], [0]>} : vector<1x8x8xbf16>, vector<1x8x16xbf16>, vector<1x8x16xf32> -> vector<1x8x16xf32>
    "tpu.trace_stop"() : () -> ()
    %126 = tpu.concatenate %62, %83, %104, %125 in 2 : vector<1x8x16xf32>, vector<1x8x16xf32>, vector<1x8x16xf32>, vector<1x8x16xf32> -> vector<1x8x64xf32>
    %127 = vector.shape_cast %126 : vector<1x8x64xf32> to vector<8x64xf32>
    %128 = arith.truncf %127 : vector<8x64xf32> to vector<8x64xbf16>
    %c0_41 = arith.constant 0 : index
    %c0_42 = arith.constant 0 : index
    %129 = vector.load %arg3[%c0_41, %c0_42] : memref<64x64xbf16, #tpu.memory_space<vmem>>, vector<64x64xbf16>
    %cst_43 = arith.constant dense<0.000000e+00> : vector<8x64xf32>
    %130 = tpu.matmul %128, %129, %cst_43 {dimension_numbers = #tpu.dot_dimension_numbers<[1], [0], [0], [1], [0, 0, 1, 1], [], []>} : vector<8x64xbf16>, vector<64x64xbf16>, vector<8x64xf32> -> vector<8x64xf32>
    %131 = vector.shape_cast %130 : vector<8x64xf32> to vector<1x8x64xf32>
    %c0_44 = arith.constant 0 : index
    %c0_45 = arith.constant 0 : index
    %c0_46 = arith.constant 0 : index
    %132 = vector.load %arg10[%c0_44, %c0_45, %c0_46] : memref<1x8x64xf32, #tpu.memory_space<vmem>>, vector<1x8x64xf32>
    tpu.vector_store %arg10[%c0_44, %c0_45, %c0_46], %131 {strides = array<i32>} : memref<1x8x64xf32, #tpu.memory_space<vmem>>, vector<1x8x64xf32>,
    return
  }
  func.func @transform_0(%arg0: i32) -> (i32, i32, i32) {
    %c0_i32 = arith.constant 0 : i32
    %c0_i32_0 = arith.constant 0 : i32
    %c0_i32_1 = arith.constant 0 : i32
    return %arg0, %c0_i32, %c0_i32_0 : i32, i32, i32
  }
  func.func @transform_1(%arg0: i32) -> (i32, i32) {
    %c0_i32 = arith.constant 0 : i32
    %c0_i32_0 = arith.constant 0 : i32
    %c0_i32_1 = arith.constant 0 : i32
    return %c0_i32, %c0_i32_0 : i32, i32
  }
  func.func @transform_2(%arg0: i32) -> (i32, i32) {
    %c0_i32 = arith.constant 0 : i32
    %c0_i32_0 = arith.constant 0 : i32
    %c0_i32_1 = arith.constant 0 : i32
    return %c0_i32, %c0_i32_0 : i32, i32
  }
  func.func @transform_3(%arg0: i32) -> (i32, i32) {
    %c0_i32 = arith.constant 0 : i32
    %c0_i32_0 = arith.constant 0 : i32
    %c0_i32_1 = arith.constant 0 : i32
    return %c0_i32, %c0_i32_0 : i32, i32
  }
  func.func @transform_4(%arg0: i32) -> (i32, i32) {
    %c0_i32 = arith.constant 0 : i32
    %c0_i32_0 = arith.constant 0 : i32
    %c0_i32_1 = arith.constant 0 : i32
    return %c0_i32, %c0_i32_0 : i32, i32
  }
  func.func @transform_5(%arg0: i32) -> (i32, i32) {
    %c0_i32 = arith.constant 0 : i32
    %c0_i32_0 = arith.constant 0 : i32
    %c0_i32_1 = arith.constant 0 : i32
    return %c0_i32, %c0_i32_0 : i32, i32
  }
  func.func @transform_6(%arg0: i32) -> (i32, i32) {
    %c0_i32 = arith.constant 0 : i32
    %c0_i32_0 = arith.constant 0 : i32
    %c0_i32_1 = arith.constant 0 : i32
    return %c0_i32, %c0_i32_0 : i32, i32
  }
  func.func @transform_7(%arg0: i32) -> (i32, i32) {
    %c0_i32 = arith.constant 0 : i32
    %c0_i32_0 = arith.constant 0 : i32
    %c0_i32_1 = arith.constant 0 : i32
    return %c0_i32, %c0_i32_0 : i32, i32
  }
  func.func @transform_8(%arg0: i32) -> (i32, i32) {
    %c0_i32 = arith.constant 0 : i32
    %c0_i32_0 = arith.constant 0 : i32
    %c0_i32_1 = arith.constant 0 : i32
    return %c0_i32, %c0_i32_0 : i32, i32
  }
  func.func @transform_9(%arg0: i32) -> (i32, i32, i32) {
    %c0_i32 = arith.constant 0 : i32
    %c0_i32_0 = arith.constant 0 : i32
    %c0_i32_1 = arith.constant 0 : i32
    return %arg0, %c0_i32, %c0_i32_0 : i32, i32, i32
  }
}

</mosaic_0001>

<bundles_post_ra>
// kernel: tpu_custom_call.1
= control target key start
LH: loop header
LB: loop body
LE: loop exit
PB: predicated region body
PF: predicated region fallthrough
CT: control target
= control target key end

     0   :  { %s2491_s0 = inlined_call_operand.hbm [shape: bf16[2,8,64], index: 0, kind: input, shape index: {}]   ;;  %s2492_s1 = inlined_call_operand.hbm [shape: bf16[64,160], index: 1, kind: input, shape index: {}]   ;;  %s2493_s2 = inlined_call_operand.hbm [shape: bf16[64,64], index: 2, kind: input, shape index: {}]   ;;  %s2494_s3 = inlined_call_operand.vmem [shape: f32[1,128], index: 3, kind: input, shape index: {}]   ;;  %s2495_s4 = inlined_call_operand.hbm [shape: f32[1,128], index: 4, kind: input, shape index: {}]   ;;  %s2496_s5 = inlined_call_operand.vmem [shape: f32[8,128], index: 5, kind: input, shape index: {}]   ;;  %s2497_s6 = inlined_call_operand.hbm [shape: f32[8,128], index: 6, kind: input, shape index: {}]   ;;  %s2498_s7 = inlined_call_operand.hbm [shape: bf16[128,128], index: 7, kind: input, shape index: {}]   ;;  %s2499_s8 = inlined_call_operand.hbm [shape: f32[128,128], index: 8, kind: input, shape index: {}]   ;;  %s2500_s9 = inlined_call_operand.hbm [shape: f32[2,8,64], index: 9, kind: output, shape index: {}]  }
   0x1   :  { %2505 = sst [smem:[#allocation20_spill]] %s2492_s1 }
   0x2   :  { %2506 = sst [smem:[#allocation21_spill]] %s2493_s2 }
   0x3   :  { %2507 = sst [smem:[#allocation22_spill]] %s2495_s4 }
   0x4   :  { %2508 = sst [smem:[#allocation23_spill]] %s2497_s6 }
   0x5   :  { %14 = vsyncpa [#allocation3], 0 }
   0x6   :  { %16 = vsyncpa [#allocation3 + $0x1], 0 }
   0x7   :  { %17 = vsyncpa [#allocation6], 0 }
   0x8   :  { %18 = vsyncpa [#allocation9], 0 }
   0x9   :  { %19 = vsyncpa [#allocation12], 0 }
   0xa   :  { %20 = vsyncpa [#allocation4], 0 }
   0xb   :  { %22 = vsyncpa [#allocation4 + $0x1], 0  ;;  %s2139_s30 = smov 0   ;;  %s2141_s10 = smov 0  }
   0xc   :  { %s2143_s11 = smov 0   ;;  %s2145_s12 = smov 0  }
   0xd LB: > { %s2067_s13 = smov [#allocation5]   ;;  %s2160_s15 = sadd.s32 4294967295, %s2065_s12   ;;  %s2065_s12 = sphi %s2145_s12, %s2536_s12   ;;  %s2061_s11 = sphi %s2143_s11, %s2535_s11   ;;  %s2057_s10 = sphi %s2141_s10, %s2534_s10   ;;  %s2053_s30 = sphi %s2139_s30, %s2533_s30  }
   0xe   : > { %s265_s14 = sshll.u32 %s2067_s13, 4  ;;  %p1423_p0 = scmp.ge.s32.totalorder %s2065_s12, 1  ;;  %s266_s14 = int_to_ptr.vmem [resolvable:$true] %s265_s14 }
   0xf   : > { %p2501_p1 = scmp.eq.s32.totalorder %s2160_s15, 0  ;;  %p253_p2 = scmp.lt.s32.totalorder %s2065_s12, 3 }
  0x10   : > { %s2068_s17 = smov [#allocation8]   ;;  %s2069_s20 = smov [#allocation11]  }
  0x11   : > { %p2165_p3 = pnand %p1423_p0, %p253_p2  ;;  %s295_s18 = sshll.u32 %s2068_s17, 4  ;;  %s296_s18 = int_to_ptr.vmem [resolvable:$true] %s295_s18 }
  0x12   : > { %s319_s21 = sshll.u32 %s2069_s20, 4  ;;  %s1816_s23 = scalar_lea.vmem %s266_s14, 1024  ;;  %s320_s21 = int_to_ptr.vmem [resolvable:$true] %s319_s21 }
  0x13   : > { %s2509_s16 = scalar_select %p2165_p3, 1, 0 }
  0x14   : > { %p1670_p5 = pneg %p2165_p3  ;;  %p1817_p8 = scmp.ne.s32.totalorder %s266_s14, %s1816_s23 }
  0x15   : > { %p1824_p11 = scmp.lt.s32.totalorder %s266_s14, %s266_s14  ;;  %p1825_p12 = scmp.lt.s32.totalorder %s1816_s23, %s1816_s23 }
  0x16   : > { %p2174_p6 = pnand %p1670_p5, %p2501_p1 }
  0x17   : > { %p1826_p13 = por %p1825_p12, %p1824_p11 }
  0x18   : > { %p2180_p7 = pneg %p2174_p6 }
  0x1a   : > { %p1819_p9 = pnand %p1817_p8, %p2180_p7 }
  0x1c   : > { %p1820_p10 = pneg %p1819_p9 }
  0x1e   : > { %p1827_p0 = pnand %p1826_p13, %p1820_p10 }
  0x20   : > { %1830 = shalt.err (!%p1827_p0)
}
  0x21   : > { %s2070_s24 = smov 128   ;;  %s2071_s25 = smov 8  }
  0x22   : > { %s2512_s1 = sld [smem:[#allocation20_spill]]  ;;  %s1842_s28 = scalar_lea.vmem %s296_s18, 16 }
  0x23   : > { %p1843_p2 = scmp.ne.s32.totalorder %s296_s18, %s1842_s28  ;;  %s1849_s29 = scalar_lea.vmem %s296_s18, 32 }
  0x24   : > { %p1850_p9 = scmp.lt.s32.totalorder %s296_s18, %s296_s18  ;;  %p1851_p10 = scmp.lt.s32.totalorder %s1849_s29, %s1842_s28 }
  0x25   : > { %p1845_p5 = pnand %p1843_p2, %p2180_p7 }
  0x26   : > { %p1852_p11 = por %p1851_p10, %p1850_p9 }
  0x27   : > { %p1846_p8 = pneg %p1845_p5 }
  0x28   : > { %1673 = dma.hbm_to_vmem [thread:$0]  (!%p2174_p6), %s2512_s1, 1024, %s266_s14, [#allocation6], %s2070_s24, %s2070_s24, %s2071_s25  }
  0x29   : > { %p1853_p12 = pnand %p1852_p11, %p1846_p8 }
  0x2b   : > { %1856 = shalt.err (!%p1853_p12)
}
  0x2c   : > { %s2513_s4 = sld [smem:[#allocation22_spill]]  ;;  %s1868_s14 = scalar_lea.vmem %s320_s21, 1024 }
  0x2d   : > { %p1869_p13 = scmp.ne.s32.totalorder %s320_s21, %s1868_s14  ;;  %p1876_p5 = scmp.lt.s32.totalorder %s320_s21, %s320_s21 }
  0x2e   : > { %p1877_p4 = scmp.lt.s32.totalorder %s1868_s14, %s1868_s14 }
  0x2f   : > { %p1871_p0 = pnand %p1869_p13, %p2180_p7 }
  0x30   : > { %p1878_p1 = por %p1877_p4, %p1876_p5 }
  0x31   : > { %p1872_p2 = pneg %p1871_p0 }
  0x32   : > { %1679 = dma.hbm_to_vmem [thread:$0]  (!%p2174_p6), %s2513_s4, 16, %s296_s18, [#allocation9]  }
  0x33   : > { %p1879_p3 = pnand %p1878_p1, %p1872_p2 }
  0x35   : > { %1882 = shalt.err (!%p1879_p3)
}
  0x36   : > { %s2072_s20 = smov 64   ;;  %s2073_s23 = smov 4  }
  0x37   : > { %1685 = dma.hbm_to_vmem [thread:$0]  (!%p2174_p6), %s2498_s7, 1024, %s320_s21, [#allocation12], %s2072_s20, %s2072_s20, %s2073_s23  }
  0x38   : > { %s2074_s18 = smov [#allocation7]   ;;  %s2075_s29 = smov [#allocation10]  }
  0x39   : > { %s278_s28 = sshll.u32 %s2074_s18, 4  ;;  %s309_s13 = sshll.u32 %s2075_s29, 4  ;;  %s279_s28 = int_to_ptr.vmem [resolvable:$true] %s278_s28  ;;  %s310_s13 = int_to_ptr.vmem [resolvable:$true] %s309_s13 }
  0x3a   : > { %s1894_s17 = scalar_lea.vmem %s279_s28, 512  ;;  %p1902_p3 = scmp.lt.s32.totalorder %s279_s28, %s279_s28 }
  0x3b   : > { %p1895_p8 = scmp.ne.s32.totalorder %s279_s28, %s1894_s17  ;;  %p1903_p9 = scmp.lt.s32.totalorder %s1894_s17, %s1894_s17 }
  0x3d   : > { %p1897_p4 = pnand %p1895_p8, %p2180_p7  ;;  %p1904_p10 = por %p1903_p9, %p1902_p3 }
  0x3f   : > { %p1898_p1 = pneg %p1897_p4 }
  0x41   : > { %p1905_p11 = pnand %p1904_p10, %p1898_p1 }
  0x43   : > { %1908 = shalt.err (!%p1905_p11)
}
  0x44   : > { %s2514_s2 = sld [smem:[#allocation21_spill]]  ;;  %s1920_s21 = scalar_lea.vmem %s310_s13, 128 }
  0x45   : > { %p1921_p12 = scmp.ne.s32.totalorder %s310_s13, %s1920_s21  ;;  %p1928_p2 = scmp.lt.s32.totalorder %s310_s13, %s310_s13 }
  0x46   : > { %p1929_p5 = scmp.lt.s32.totalorder %s1920_s21, %s1920_s21 }
  0x47   : > { %p1923_p13 = pnand %p1921_p12, %p2180_p7 }
  0x48   : > { %p1930_p8 = por %p1929_p5, %p1928_p2 }
  0x49   : > { %p1924_p0 = pneg %p1923_p13 }
  0x4a   : > { %1676 = dma.hbm_to_vmem [thread:$0]  (!%p2174_p6), %s2514_s2, 512, %s279_s28, [#allocation6], %s2072_s20, %s2072_s20, %s2073_s23  }
  0x4b   : > { %p1931_p4 = pnand %p1930_p8, %p1924_p0 }
  0x4d   : > { %1934 = shalt.err (!%p1931_p4)
}
  0x4e   : > { %s2515_s6 = sld [smem:[#allocation23_spill]]  ;;  %s2076_s29 = smov [#allocation13]  }
  0x4f   : > { %s332_s20 = sshll.u32 %s2076_s29, 4  ;;  %s333_s20 = int_to_ptr.vmem [resolvable:$true] %s332_s20 }
  0x50   : > { %s1946_s23 = scalar_lea.vmem %s333_s20, 2048  ;;  %p1954_p10 = scmp.lt.s32.totalorder %s333_s20, %s333_s20 }
  0x51   : > { %p1947_p1 = scmp.ne.s32.totalorder %s333_s20, %s1946_s23  ;;  %p1955_p11 = scmp.lt.s32.totalorder %s1946_s23, %s1946_s23 }
  0x53   : > { %p1949_p3 = pnand %p1947_p1, %p2180_p7  ;;  %p1956_p12 = por %p1955_p11, %p1954_p10 }
  0x54   : > { %1682 = dma.hbm_to_vmem [thread:$0]  (!%p2174_p6), %s2515_s6, 128, %s310_s13, [#allocation9]  }
  0x55   : > { %p1950_p9 = pneg %p1949_p3 }
  0x57   : > { %p1957_p13 = pnand %p1956_p12, %p1950_p9 }
  0x59   : > { %1960 = shalt.err (!%p1957_p13)
}
  0x5a   : > { %1688 = dma.hbm_to_vmem [thread:$0]  (!%p2174_p6), %s2499_s8, 2048, %s333_s20, [#allocation12], %s2070_s24, %s2070_s24, %s2071_s25  }
  0x5b   : > { %s1422_s19 = sadd.s32 4294967294, %s2065_s12   ;;  %s2234_s22 = sadd.s32 1, %s2065_s12  }
  0x5c   : > { %s32_s17 = ssub.s32 %s2065_s12, %s2234_s22  ;;  %s35_s14 = sadd.s32 1, %s2061_s11 }
  0x5d   : > { %p33_p7 = scmp.eq.s32.totalorder %s32_s17, 0  ;;  %p42_p0 = scmp.ne.s32.totalorder %s2061_s11, %s2057_s10 }
  0x5e   : > { %p43_p2 = scmp.eq.s32.totalorder %s2065_s12, 0  ;;  %p48_p5 = scmp.ne.s32.totalorder %s2057_s10, %s2053_s30 }
  0x5f   : > { %s2245_s26 = scalar_select %p33_p7, %s2061_s11, %s35_s14  }
  0x60   : > { %p2247_p8 = por %p43_p2, %p42_p0  ;;  %p2517_p4 = scmp.eq.s32.totalorder %s2160_s15, 0 }
  0x61   : > { %p240_p1 = scmp.eq.s32.totalorder %s2160_s15, 1  ;;  %p246_p3 = scmp.eq.s32.totalorder %s1422_s19, 1 }
  0x62   : > { %p2253_p6 = por %p2517_p4, %p48_p5  ;;  %p1703_p9 = scmp.lt.s32.totalorder %s2065_s12, 2 }
  0x63   : > { %s346_s25 = sand.u32 1, %s2061_s11   ;;  %p2260_p10 = por %p240_p1, %p42_p0 }
  0x64   : > { %s2518_s24 = scalar_select %p2253_p6, 1, 0 }
  0x65   : > { %s2519_s27 = scalar_select %p2260_p10, 1, 0 }
  0x66   : > { %p2264_p11 = por %p246_p3, %p48_p5  ;;  %s1431_s29 = sshll.u32 %s346_s25, 2 }
  0x67   : > { %s1432_s20 = sshll.u32 %s2065_s12, 6  ;;  %s350_s19 = scalar_lea.vmem [#allocation2], %s1431_s29 }
  0x68   : > { %s2520_s18 = scalar_select %p2264_p11, 1, 0 }
  0x69   : > { %s2272_s13 = scalar_lea.hbm %s2491_s0, %s1432_s20  ;;  %s357_s17 = sshll.u32 %s350_s19, 4  ;;  %s358_s17 = int_to_ptr.vmem [resolvable:$true] %s357_s17 }
  0x6a   : > { %p2276_p12 = pnand %p1703_p9, %p2247_p8  ;;  %s347_s1 = scalar_lea.sflag [#allocation3], %s346_s25 }
  0x6b   : > { %s1961_s2 = scalar_lea.hbm %s2272_s13, 64  ;;  %s1966_s28 = scalar_lea.hbm %s2491_s0, 128 }
  0x6c   : > { %p1962_p13 = scmp.ne.s32.totalorder %s2272_s13, %s1961_s2  ;;  %p1963_p7 = pneg %p2276_p12 }
  0x6d   : > { %p1967_p5 = scmp.lt.s32.totalorder %s2272_s13, %s2491_s0  ;;  %p1968_p8 = scmp.lt.s32.totalorder %s1966_s28, %s1961_s2 }
  0x6e   : > { %p1964_p0 = pnand %p1963_p7, %p1962_p13 }
  0x6f   : > { %p1969_p4 = por %p1968_p8, %p1967_p5 }
  0x70   : > { %p1965_p2 = pneg %p1964_p0 }
  0x72   : > { %p1970_p1 = pnand %p1969_p4, %p1965_p2 }
  0x74   : > { %1973 = shalt.err (!%p1970_p1)
}
  0x75   : > { %s1974_s21 = scalar_lea.vmem %s358_s17, 64  ;;  %s2077_s25 = smov [#allocation2]  }
  0x76   : > { %p1975_p3 = scmp.ne.s32.totalorder %s358_s17, %s1974_s21  ;;  %s1979_s4 = sshll.u32 %s2077_s25, 4  ;;  %s1980_s4 = int_to_ptr.vmem [resolvable:$false] %s1979_s4 }
  0x77   : > { %s1981_s6 = scalar_lea.vmem %s1980_s4, 128  ;;  %p1982_p13 = scmp.lt.s32.totalorder %s358_s17, %s1980_s4 }
  0x78   : > { %p1977_p9 = pnand %p1975_p3, %p1963_p7  ;;  %p1983_p0 = scmp.lt.s32.totalorder %s1981_s6, %s1974_s21 }
  0x7a   : > { %p1978_p11 = pneg %p1977_p9  ;;  %p1984_p10 = por %p1983_p0, %p1982_p13 }
  0x7c   : > { %p1985_p6 = pnand %p1984_p10, %p1978_p11 }
  0x7e   : > { %1988 = shalt.err (!%p1985_p6)
}
  0x7f   : > { %1692 = dma.hbm_to_vmem [thread:$0]  (!%p2276_p12), %s2272_s13, 64, %s358_s17, %s347_s1  }
  0x80   : > { %p2522_p2 = scmp.ne.s32.totalorder %s2509_s16, 0 }
  0x81   : > { %s2297_s2 = sand.u32 (!%p2522_p2), 1, %s2057_s10   ;;  %p2523_p7 = scmp.ne.s32.totalorder (!%p2522_p2), %s2518_s24, 0 }
  0x82   : > { %366 = sbr.rel (%p2522_p2) target bundleno = 2459 (0x99b), region = 56  ;;  %s1434_s20 = sshll.u32 (!%p2522_p2), %s2297_s2, 2 }
  0x83   : > { %s369_s23 = scalar_lea.sflag (!%p2522_p2), [#allocation3], %s2297_s2  ;;  %s2301_s4 = scalar_lea.vmem (!%p2522_p2), [#allocation2], %s1434_s20 }
  0x87   : > { %2032 = dma.done.wait (%p2523_p7), %s369_s23, 64  }
  0x88   : > { %2034 = vsyncadd (%p2523_p7), %s369_s23, 4294967232  ;;  %p2524_p6 = scmp.eq.s32.totalorder %s2160_s15, 0 }
  0x8a   : > { %2036 = dma.done.wait (%p2524_p6), [#allocation6], 1536   ;;  %p2525_p10 = pmov %p2524_p6 }
  0x8b   : > { %p2526_p11 = pmov %p2524_p6 }
  0x8c   : > { %2038 = vsyncadd (%p2525_p10), [#allocation6], 4294965760 }
  0x8d   : > { %2040 = dma.done.wait (%p2526_p11), [#allocation9], 144   ;;  %p2527_p12 = pmov %p2524_p6 }
  0x8e   : > { %p2528_p5 = pmov %p2524_p6 }
  0x8f   : > { %2042 = vsyncadd (%p2527_p12), [#allocation9], 4294967152 }
  0x90   : > { %2044 = dma.done.wait (%p2528_p5), [#allocation12], 3072   ;;  %p2529_p8 = pmov %p2528_p5 }
  0x91   : > { %v2078_v0 = vmov 0   ;;  %v2079_v1 = vmov 0.0   ;;  %v1763_v2 = vld [vmem:[#allocation5 + $0x34] ss:$8 sps:$4 sm:$0xff]   ;;  %v1765_v3 = vld [vmem:[#allocation5 + $0x30] ss:$8 sps:$4 sm:$0xff]  }
  0x92   : > { %2046 = vsyncadd (%p2529_p8), [#allocation12], 4294964224  ;;  %517 = vmatprep.mubr.bf16.mxu0 %v2078_v0  ;;  %1527 = vmatprep.subr.bf16.mxu1 %v2079_v1  ;;  %v1766_v4 = vld [vmem:[#allocation5 + $0x24] ss:$8 sps:$4 sm:$0xff]   ;;  %v1768_v5 = vld [vmem:[#allocation5 + $0x20] ss:$8 sps:$4 sm:$0xff]  }
  0x93   : > { %493 = vmatprep.subr.bf16.mxu0 %v1763_v2  ;;  %v1769_v6 = vld [vmem:[#allocation5 + $0x14] ss:$8 sps:$4 sm:$0xff]   ;;  %v1771_v7 = vld [vmem:[#allocation5 + $0x10] ss:$8 sps:$4 sm:$0xff]   ;;  %v1775_v8 = vld [vmem:[#allocation11 + $0x38] sm:$0xff]   ;;  %vm481_vm0 = vcmask 523264  }
  0x94   : > { %494 = vmatpush1.bf16.msra.mxu0 %v1765_v3  ;;  %v1772_v9 = vld [vmem:[#allocation5 + $0x4] ss:$8 sps:$4 sm:$0xff]   ;;  %1528 = vmatpush3.bf16.msra.mxu1 %v1775_v8  ;;  %v1776_v10 = vld [vmem:[#allocation11 + $0x30] sm:$0xff]   ;;  %v1777_v12 = vld [vmem:[#allocation11 + $0x28] sm:$0xff]   ;;  %vm2080_vm1 = vmmov 0   ;;  %s2081_s13 = smov 48   ;;  %v745_v3 = vlaneseq }
  0x95   : > { %495 = vmatprep.subr.bf16.mxu0 %v1766_v4  ;;  %1529 = vmatprep.subr.bf16.mxu1 %v2079_v1  ;;  %v1774_v11 = vld [vmem:[#allocation5] ss:$8 sps:$4 sm:$0xff]   ;;  %v432_v13 = vld [vmem:[%s2301_s4] sm:$0xf]  ;;  %s2082_s17 = smov 64   ;;  %vm755_vm2 = vcmask 130048  }
  0x96   : > { %v1778_v14 = vld [vmem:[#allocation11 + $0x20] sm:$0xff]   ;;  %v1779_v15 = vld [vmem:[#allocation11 + $0x18] sm:$0xff]   ;;  %v1780_v16 = vld [vmem:[#allocation11 + $0x10] sm:$0xff]   ;;  %1543 = vmatprep.mubr.msk.bf16.mxu1 %vm2080_vm1, %v2079_v1  ;;  %vm819_vm3 = vcmask 1043456   ;;  %v2372_v4 = vshrl.u32 %v745_v3, 7  ;;  %vm803_vm5 = vcmask 64512  }
  0x97   : > { %v1781_v17 = vld [vmem:[#allocation11 + $0x8] sm:$0xff]   ;;  %v1782_v18 = vld [vmem:[#allocation11] sm:$0xff]   ;;  %v664_v19 = vld [vmem:[#allocation13 + $0x78] sm:$0xff]  ;;  %s2083_s14 = smov 80   ;;  %s2084_s28 = smov 112   ;;  %vm1200_vm6 = vcmask 261120  }
  0x98   : > { %496 = vmatpush1.bf16.msra.mxu0 %v1768_v5  ;;  %1530 = vmatpush3.bf16.msra.mxu1 %v1776_v10  ;;  %v663_v20 = vld [vmem:[#allocation13 + $0x70] sm:$0xff]  ;;  %v662_v21 = vld [vmem:[#allocation13 + $0x68] sm:$0xff]  ;;  %v661_v22 = vld [vmem:[#allocation13 + $0x60] sm:$0xff]  ;;  %v2374_v5 = vand.u32 127, %v745_v3  ;;  %s2085_s29 = smov 32   ;;  %s2086_s19 = smov 96  }
  0x99   : > { %497 = vmatprep.subr.bf16.mxu0 %v1769_v6  ;;  %1531 = vmatprep.subr.bf16.mxu1 %v2079_v1  ;;  %v660_v23 = vld [vmem:[#allocation13 + $0x58] sm:$0xff]  ;;  %v659_v24 = vld [vmem:[#allocation13 + $0x50] sm:$0xff]  ;;  %v658_v25 = vld [vmem:[#allocation13 + $0x48] sm:$0xff]  ;;  %s2087_s21 = smov 16   ;;  %vm1202_vm7 = vcmask 392192   ;;  %s1441_s25 = sshll.u32 %s2297_s2, 3 }
  0x9a   : > { %v657_v26 = vld [vmem:[#allocation13 + $0x40] sm:$0xff]  ;;  %v656_v27 = vld [vmem:[#allocation13 + $0x38] sm:$0xff]  ;;  %v655_v28 = vld [vmem:[#allocation13 + $0x30] sm:$0xff]  ;;  %vm749_vm4 = vcmp.le.s32.totalorder %v2374_v5, %v2372_v4  ;;  %s1477_s20 = sshll.u32 %s2160_s15, 7  ;;  %s430_s23 = scalar_lea.vmem [#allocation14], %s1441_s25 }
  0x9b   : > { %v654_v29 = vld [vmem:[#allocation13 + $0x28] sm:$0xff]  ;;  %v653_v30 = vld [vmem:[#allocation13 + $0x20] sm:$0xff]  ;;  %v652_v39 = vld [vmem:[#allocation13 + $0x18] sm:$0xff]  ;;  %s1295_s4 = sshll.u32 %s430_s23, 4  ;;  %s2447_s16 = scalar_lea.hbm %s2500_s9, %s1477_s20  ;;  %s2449_s4 = int_to_ptr.vmem [resolvable:$true] %s1295_s4 }
  0x9c   : > { %498 = vmatpush1.bf16.msra.mxu0 %v1771_v7  ;;  %1532 = vmatpush3.bf16.msra.mxu1 %v1777_v12  ;;  %v1453_v32 = vld [vmem:[%s2494_s3] ss:$0 sm:$0xff]  ;;  %v651_v40 = vld [vmem:[#allocation13 + $0x10] sm:$0xff]  ;;  %v649_v42 = vld [vmem:[#allocation13] sm:$0xff]  ;;  %s1282_s24 = scalar_lea.sflag [#allocation4], %s2297_s2  ;;  %p2530_p1 = scmp.ne.s32.totalorder %s2519_s27, 0 }
  0x9d   : > { %499 = vmatprep.subr.bf16.mxu0 %v1772_v9  ;;  %1533 = vmatprep.subr.bf16.mxu1 %v2079_v1  ;;  %v650_v41 = vld [vmem:[#allocation13 + $0x8] sm:$0xff]  ;;  %v644_v44 = vld [vmem:[#allocation10] sm:$0xff]  ;;  %v1462_v57 = vld [vmem:[#allocation8] ss:$0 sm:$0xff]  ;;  %s2088_s15 = smov [#allocation14]  }
  0x9e   : > { %v643_v43 = vld [vmem:[%s2496_s5] sm:$0xff] }
  0xa0   : > { %500 = vmatpush1.bf16.msra.mxu0 %v1774_v11  ;;  %1534 = vmatpush3.bf16.msra.mxu1 %v1778_v14 }
  0xa1   : > { %1547 = vmatprep.subr.mxu0 %v2079_v1  ;;  %1535 = vmatprep.subr.bf16.mxu1 %v2079_v1 }
  0xa3   : > { %1450 = vmatmul.mubr.msk.bf16.vlgmr.msra.gmra.mxu0 %vm481_vm0, %v432_v13 }
  0xa4   : > { %1536 = vmatpush3.bf16.msra.mxu1 %v1779_v15  ;;  %1579 = vmatprep.mubr.msk.f32.mxu0 %vm2080_vm1, %v2079_v1 }
  0xa5   : > { %1537 = vmatprep.subr.bf16.mxu1 %v2079_v1  ;;  %1548 = vmatpush3.msra.mxu0 %v664_v19 }
  0xa6   : > { %1549 = vmatprep.subr.mxu0 %v2079_v1 }
  0xa7   : > { %1550 = vmatpush3.msra.mxu0 %v663_v20 }
  0xa8   : > { %1538 = vmatpush3.bf16.msra.mxu1 %v1780_v16  ;;  %1551 = vmatprep.subr.mxu0 %v2079_v1 }
  0xa9   : > { %1539 = vmatprep.subr.bf16.mxu1 %v2079_v1  ;;  %1552 = vmatpush3.msra.mxu0 %v662_v21 }
  0xaa   : > { %1553 = vmatprep.subr.mxu0 %v2079_v1 }
  0xab   : > { %1554 = vmatpush3.msra.mxu0 %v661_v22 }
  0xac   : > { %1540 = vmatpush3.bf16.msra.mxu1 %v1781_v17  ;;  %1555 = vmatprep.subr.mxu0 %v2079_v1 }
  0xad   : > { %1541 = vmatprep.subr.bf16.mxu1 %v2079_v1  ;;  %1556 = vmatpush3.msra.mxu0 %v660_v23 }
  0xae   : > { %1557 = vmatprep.subr.mxu0 %v2079_v1 }
  0xaf   : > { %1558 = vmatpush3.msra.mxu0 %v659_v24 }
  0xb0   : > { %1542 = vmatpush3.bf16.msra.mxu1 %v1782_v18  ;;  %1559 = vmatprep.subr.mxu0 %v2079_v1 }
  0xb1   : > { %1582 = vmatprep.subr.bf16.mxu1 %v2079_v1  ;;  %1560 = vmatpush3.msra.mxu0 %v658_v25 }
  0xb2   : > { %1561 = vmatprep.subr.mxu0 %v2079_v1 }
  0xb3   : > { %1562 = vmatpush3.msra.mxu0 %v657_v26 }
  0xb4   : > { %1563 = vmatprep.subr.mxu0 %v2079_v1 }
  0xb5   : > { %1564 = vmatpush3.msra.mxu0 %v656_v27 }
  0xb6   : > { %1565 = vmatprep.subr.mxu0 %v2079_v1 }
  0xb7   : > { %1566 = vmatpush3.msra.mxu0 %v655_v28 }
  0xb8   : > { %1567 = vmatprep.subr.mxu0 %v2079_v1 }
  0xb9   : > { %1568 = vmatpush3.msra.mxu0 %v654_v29 }
  0xba   : > { %1569 = vmatprep.subr.mxu0 %v2079_v1 }
  0xbb   : > { %1570 = vmatpush3.msra.mxu0 %v653_v30 }
  0xbc   : > { %1571 = vmatprep.subr.mxu0 %v2079_v1 }
  0xbd   : > { %1572 = vmatpush3.msra.mxu0 %v652_v39 }
  0xbe   : > { %1573 = vmatprep.subr.mxu0 %v2079_v1 }
  0xbf   : > { %1574 = vmatpush3.msra.mxu0 %v651_v40 }
  0xc0   : > { %1575 = vmatprep.subr.mxu0 %v2079_v1 }
  0xc1   : > { %1576 = vmatpush3.msra.mxu0 %v650_v41 }
  0xc2   : > { %1577 = vmatprep.subr.mxu0 %v2079_v1 }
  0xc3   : > { %1578 = vmatpush3.msra.mxu0 %v649_v42 }
  0xc4   : > { %1606 = vmatprep.subr.bf16.mxu0 %v2079_v1 }
 0x163   : > { %v519_v31 = vpop.f32.mrf.mxu0 }
 0x164   : > { %v1451_v33 = vclamps-f32 %v519_v31, 8.0 }
 0x165   : > { %v521_v34 = vpop.f32.mrf.mxu0 }
 0x166   : > { %v537_v35 = vadd.f32 %v1453_v32, %v1451_v33  ;;  %v1452_v62 = vclamps-f32 %v521_v34, 8.0 }
 0x167   : > { %v523_v36 = vpop.f32.mrf.mxu0 }
 0x168   : > { %v538_v37 = vpack.c.bf16 %v537_v35, %v537_v35  ;;  %v645_v46 = vmul.f32 %v643_v43, %v537_v35  ;;  %v2364_v0 = vpack.c.bf16 %v1452_v62, %v1452_v62 }
 0x169   : > { %v524_v38 = vpop.f32.mrf.mxu0 }
 0x16a   : > { %1544 = vmatmul.mubr.bf16.vlgmr.msra.gmra.mxu1 %v538_v37  ;;  %v821_v2 = vsel %vm819_vm3, %v2364_v0, 0 }
 0x16b   : > { %1584 = vmatprep.mubr.msk.bf16.mxu1 %vm2080_vm1, %v2079_v1 }
 0x22a   : > { %v637_v45 = vpop.f32.mrf.mxu1 }
 0x22b   : > { %v646_v47 = vmul.f32 %v644_v44, %v637_v45 }
 0x22c   : > { %v1545_v48 = vpop.f32.mrf.mxu1 }
 0x22d   : > { %v647_v49 = vadd.f32 %v646_v47, %v645_v46 }
 0x22e   : > { %v640_v50 = vpop.f32.mrf.mxu1 }
 0x22f   : > { %v648_v51 = vmul.f32 %v647_v49, %v647_v49 }
 0x230   : > { %v1546_v52 = vpop.f32.mrf.mxu1 }
 0x231   : > { %1580 = vmatmul.mubr.f32.vlgmr.msra.gmra.mxu0 %v648_v51 }
 0x232   : > { %1608 = vmatprep.mubr.msk.bf16.mxu0 %vm2080_vm1, %v2079_v1 }
 0x2f1   : > { %v731_v53 = vpop.f32.mrf.mxu0 }
 0x2f2   : > { %v732_v54 = vadd.f32 1.1920929e-07, %v731_v53 }
 0x2f3   : > { %v1581_v55 = vpop.f32.mrf.mxu0 }
 0x2f4   : > { %1787 = vrsqrt.f32 %v732_v54 }
 0x301   : > { %v1788_v56 = vpop.eup %1787 }
 0x302   : > { %v736_v58 = vmul.f32 %v1788_v56, %v647_v49 }
 0x304   : > { %v744_v59 = vmul.f32 %v1462_v57, %v736_v58 }
 0x306   : > { %v750_v60 = vpack.c.bf16 %v744_v59, %v744_v59 }
 0x308   : > { %865 = vrot.lane.b32.xlu1 %v750_v60, %s2081_s13  ;;  %753 = vrot.lane.b32.xlu0 %v750_v60, %s2082_s17  ;;  %s1993_s17 = sshll.u32 %s2088_s15, 4  ;;  %s1994_s17 = int_to_ptr.vmem [resolvable:$false] %s1993_s17 }
 0x309   : > { %p1996_p13 = scmp.lt.s32.totalorder %s2449_s4, %s1994_s17 }
 0x37a   : > { %v754_v61 = vpop.permute.xlu0 %753  ;;  %v866_v17 = vpop.permute.xlu1 %865 }
 0x37b   : > { %v760_v63 = vsel %vm755_vm2, %v754_v61, 0  ;;  %v871_v28 = vsel %vm755_vm2, %v866_v17, 0 }
 0x37c   : > { %1583 = vmatpush3.bf16.xpose.msra.mxu1 %v760_v63 }
 0x37d   : > { %1588 = vmatprep.subr.bf16.mxu1 %v2079_v1 }
 0x383   : > { %1585 = vmatmul.mubr.msk.bf16.vlgmr.msra.gmra.mxu1 %vm755_vm2, %v750_v60 }
 0x384   : > { %1589 = vmatpush3.bf16.msra.mxu1 %v821_v2  ;;  %1590 = vmatprep.mubr.msk.bf16.mxu1 %vm2080_vm1, %v2079_v1 }
 0x385   : > { %1594 = vmatprep.subr.bf16.mxu1 %v2079_v1 }
 0x443   : > { %v796_v6 = vpop.f32.mrf.mxu1 }
 0x444   : > { %v802_v7 = vsel %vm749_vm4, %v796_v6, -1e+30 }
 0x445   : > { %v1586_v8 = vpop.f32.mrf.mxu1  ;;  %v804_v9 = vsel %vm803_vm5, %v802_v7, -inf }
 0x446   : > { %805 = vmax.xlane.f32.xlu0 %v804_v9 }
 0x447   : > { %v799_v10 = vpop.f32.mrf.mxu1 }
 0x449   : > { %v1587_v11 = vpop.f32.mrf.mxu1 }
 0x45c   : > { %1081 = vrot.lane.b32.xlu0 %v750_v60, %s2083_s14  ;;  %s1995_s14 = scalar_lea.vmem %s1994_s17, 256 }
 0x4cf   : > { %v806_v12 = vpop.xlane.xlu0 %805 }
 0x4d0   : > { %v807_v13 = vsub.f32 %v802_v7, %v806_v12 }
 0x4d2   : > { %v808_v14 = vmul.f32 1.442695, %v807_v13 }
 0x4d3   : > { %v1082_v29 = vpop.permute.xlu0 %1081 }
 0x4d4   : > { %1789 = vpow2.f32 %v808_v14 }
 0x4e1   : > { %v1790_v15 = vpop.eup %1789 }
 0x4e2   : > { %v810_v16 = vsel %vm803_vm5, %v1790_v15, 0.0 }
 0x4e3   : > { %811 = vadd.xlane.f32.xlu1 %v810_v16 }
 0x4f4   : > { %863 = vrot.lane.b32.xlu1 %v750_v60, %s2084_s28 }
 0x4f8   : > { %971 = vrot.lane.b32.xlu1 %v750_v60, %s2085_s29 }
 0x4fc   : > { %969 = vrot.lane.b32.xlu1 %v750_v60, %s2086_s19 }
 0x500   : > { %1083 = vrot.lane.b32.xlu1 %v750_v60, %s2087_s21 }
 0x56c   : > { %v812_v18 = vpop.xlane.xlu1 %811 }
 0x56d   : > { %1791 = vrcp.f32 %v812_v18  ;;  %v1783_v18 = vld [vmem:[#allocation7 + $0x18] sm:$0xff]  }
 0x570   : > { %v864_v19 = vpop.permute.xlu1 %863 }
 0x574   : > { %v972_v20 = vpop.permute.xlu1 %971 }
 0x575   : > { %v977_v21 = vsel %vm755_vm2, %v972_v20, 0  ;;  %v1785_v20 = vld [vmem:[#allocation7 + $0x8] sm:$0xff]  }
 0x576   : > { %1607 = vmatpush3.bf16.xpose.msra.mxu0 %v977_v21 }
 0x577   : > { %1618 = vmatprep.subr.bf16.mxu0 %v2079_v1 }
 0x578   : > { %v970_v22 = vpop.permute.xlu1 %969 }
 0x57a   : > { %v1792_v23 = vpop.eup %1791 }
 0x57b   : > { %v814_v24 = vmul.f32 %v1792_v23, %v1790_v15  ;;  %v1786_v23 = vld [vmem:[#allocation7] sm:$0xff]  }
 0x57c   : > { %v1084_v25 = vpop.permute.xlu1 %1083 }
 0x57d   : > { %v1089_v26 = vsel %vm755_vm2, %v1084_v25, 0  ;;  %1609 = vmatmul.mubr.msk.bf16.vlgmr.msra.gmra.mxu0 %vm755_vm2, %v970_v22  ;;  %v815_v27 = vpack.c.bf16 %v814_v24, %v814_v24 }
 0x57e   : > { %1619 = vmatpush3.bf16.xpose.msra.mxu0 %v1089_v26  ;;  %1620 = vmatprep.mubr.msk.bf16.mxu0 %vm2080_vm1, %v2079_v1 }
 0x57f   : > { %1591 = vmatmul.mubr.msk.bf16.vlgmr.msra.gmra.mxu1 %vm803_vm5, %v815_v27  ;;  %1630 = vmatprep.subr.bf16.mxu0 %v2079_v1 }
 0x580   : > { %1595 = vmatpush3.bf16.xpose.msra.mxu1 %v871_v28  ;;  %1596 = vmatprep.mubr.msk.bf16.mxu1 %vm2080_vm1, %v2079_v1 }
 0x581   : > { %1600 = vmatprep.subr.bf16.mxu1 %v2079_v1 }
 0x585   : > { %1621 = vmatmul.mubr.msk.bf16.vlgmr.msra.gmra.mxu0 %vm755_vm2, %v1082_v29 }
 0x586   : > { %1638 = vmatprep.mubr.msk.bf16.mxu0 %vm2080_vm1, %v2079_v1  ;;  %1631 = vmatpush3.bf16.msra.mxu0 %v1783_v18 }
 0x587   : > { %1597 = vmatmul.mubr.msk.bf16.vlgmr.msra.gmra.mxu1 %vm755_vm2, %v864_v19  ;;  %1632 = vmatprep.subr.bf16.mxu0 %v2079_v1  ;;  %v1784_v19 = vld [vmem:[#allocation7 + $0x10] sm:$0xff]  }
 0x588   : > { %1601 = vmatpush3.bf16.msra.mxu1 %v821_v2  ;;  %1602 = vmatprep.mubr.msk.bf16.mxu1 %vm2080_vm1, %v2079_v1 }
 0x589   : > { %1612 = vmatprep.subr.bf16.mxu1 %v2079_v1 }
 0x58a   : > { %1633 = vmatpush3.bf16.msra.mxu0 %v1784_v19 }
 0x58b   : > { %1634 = vmatprep.subr.bf16.mxu0 %v2079_v1 }
 0x58e   : > { %1635 = vmatpush3.bf16.msra.mxu0 %v1785_v20 }
 0x58f   : > { %1636 = vmatprep.subr.bf16.mxu0 %v2079_v1 }
 0x592   : > { %1637 = vmatpush3.bf16.msra.mxu0 %v1786_v23 }
 0x63d   : > { %v1013_v30 = vpop.f32.mrf.mxu0 }
 0x63e   : > { %v1019_v31 = vsel %vm749_vm4, %v1013_v30, -1e+30 }
 0x63f   : > { %v2408_v32 = vpop.f32.mrf.mxu1  ;;  %v1610_v33 = vpop.f32.mrf.mxu0  ;;  %v1020_v34 = vsel %vm803_vm5, %v1019_v31, -inf }
 0x640   : > { %1021 = vmax.xlane.f32.xlu0 %v1020_v34 }
 0x641   : > { %v1592_v35 = vpop.f32.mrf.mxu1  ;;  %v1016_v36 = vpop.f32.mrf.mxu0 }
 0x643   : > { %v860_v37 = vpop.f32.mrf.mxu1  ;;  %v1611_v38 = vpop.f32.mrf.mxu0 }
 0x645   : > { %v1593_v39 = vpop.f32.mrf.mxu1  ;;  %v1125_v40 = vpop.f32.mrf.mxu0 }
 0x646   : > { %v1131_v47 = vsel %vm749_vm4, %v1125_v40, -1e+30 }
 0x647   : > { %v907_v41 = vpop.f32.mrf.mxu1  ;;  %v1622_v42 = vpop.f32.mrf.mxu0  ;;  %v1132_v51 = vsel %vm803_vm5, %v1131_v47, -inf }
 0x648   : > { %v913_v43 = vsel %vm749_vm4, %v907_v41, -1e+30 }
 0x649   : > { %v1598_v44 = vpop.f32.mrf.mxu1  ;;  %v1128_v45 = vpop.f32.mrf.mxu0  ;;  %v914_v46 = vsel %vm803_vm5, %v913_v43, -inf }
 0x64a   : > { %915 = vmax.xlane.f32.xlu1 %v914_v46 }
 0x64b   : > { %v910_v48 = vpop.f32.mrf.mxu1  ;;  %v1623_v49 = vpop.f32.mrf.mxu0 }
 0x64d   : > { %v1599_v50 = vpop.f32.mrf.mxu1 }
 0x64e   : > { %1133 = vmax.xlane.f32.xlu1 %v1132_v51 }
 0x656   : > { %1033 = vrot.lane.b32.xlu0 %v2364_v0, %s2084_s28 }
 0x6c9   : > { %v1022_v52 = vpop.xlane.xlu0 %1021 }
 0x6ca   : > { %v1023_v53 = vsub.f32 %v1019_v31, %v1022_v52 }
 0x6cc   : > { %v1024_v56 = vmul.f32 1.442695, %v1023_v53 }
 0x6cd   : > { %v1034_v9 = vpop.permute.xlu0 %1033 }
 0x6ce   : > { %v1039_v12 = vsel %vm819_vm3, %v1034_v9, 0 }
 0x6d3   : > { %v916_v54 = vpop.xlane.xlu1 %915 }
 0x6d4   : > { %v917_v55 = vsub.f32 %v913_v43, %v916_v54 }
 0x6d6   : > { %v918_v57 = vmul.f32 1.442695, %v917_v55 }
 0x6d7   : > { %v1134_v58 = vpop.xlane.xlu1 %1133 }
 0x6d8   : > { %1793 = vpow2.f32 %v918_v57  ;;  %v1135_v59 = vsub.f32 %v1131_v47, %v1134_v58 }
 0x6d9   : > { %1795 = vpow2.f32 %v1024_v56 }
 0x6da   : > { %v1136_v60 = vmul.f32 1.442695, %v1135_v59 }
 0x6dc   : > { %1797 = vpow2.f32 %v1136_v60 }
 0x6e5   : > { %v1794_v61 = vpop.eup %1793 }
 0x6e6   : > { %v920_v62 = vsel %vm803_vm5, %v1794_v61, 0.0  ;;  %v1796_v63 = vpop.eup %1795 }
 0x6e7   : > { %921 = vadd.xlane.f32.xlu1 %v920_v62  ;;  %v1026_v2 = vsel %vm803_vm5, %v1796_v63, 0.0 }
 0x6e9   : > { %v1798_v0 = vpop.eup %1797 }
 0x6ea   : > { %v1138_v3 = vsel %vm803_vm5, %v1798_v0, 0.0 }
 0x6eb   : > { %1027 = vadd.xlane.f32.xlu1 %v1026_v2 }
 0x6ef   : > { %1139 = vadd.xlane.f32.xlu1 %v1138_v3 }
 0x770   : > { %v922_v4 = vpop.xlane.xlu1 %921 }
 0x771   : > { %1799 = vrcp.f32 %v922_v4 }
 0x774   : > { %v1028_v5 = vpop.xlane.xlu1 %1027 }
 0x775   : > { %1801 = vrcp.f32 %v1028_v5 }
 0x778   : > { %v1140_v6 = vpop.xlane.xlu1 %1139 }
 0x779   : > { %1803 = vrcp.f32 %v1140_v6 }
 0x77e   : > { %v1800_v7 = vpop.eup %1799 }
 0x77f   : > { %v924_v8 = vmul.f32 %v1800_v7, %v1794_v61 }
 0x781   : > { %v925_v10 = vpack.c.bf16 %v924_v8, %v924_v8 }
 0x782   : > { %v1802_v11 = vpop.eup %1801 }
 0x783   : > { %1603 = vmatmul.mubr.msk.bf16.vlgmr.msra.gmra.mxu1 %vm803_vm5, %v925_v10  ;;  %v1030_v13 = vmul.f32 %v1802_v11, %v1796_v63 }
 0x784   : > { %1613 = vmatpush3.bf16.msra.mxu1 %v1039_v12  ;;  %1614 = vmatprep.mubr.msk.bf16.mxu1 %vm2080_vm1, %v2079_v1 }
 0x785   : > { %1624 = vmatprep.subr.bf16.mxu1 %v2079_v1  ;;  %v1031_v14 = vpack.c.bf16 %v1030_v13, %v1030_v13 }
 0x786   : > { %v1804_v15 = vpop.eup %1803 }
 0x787   : > { %v1142_v16 = vmul.f32 %v1804_v15, %v1798_v0 }
 0x789   : > { %v1143_v17 = vpack.c.bf16 %v1142_v16, %v1142_v16 }
 0x78b   : > { %1615 = vmatmul.mubr.msk.bf16.vlgmr.msra.gmra.mxu1 %vm803_vm5, %v1031_v14 }
 0x78c   : > { %1625 = vmatpush3.bf16.msra.mxu1 %v1039_v12  ;;  %1626 = vmatprep.mubr.msk.bf16.mxu1 %vm2080_vm1, %v2079_v1 }
 0x793   : > { %1627 = vmatmul.mubr.msk.bf16.vlgmr.msra.gmra.mxu1 %vm803_vm5, %v1143_v17 }
 0x843   : > { %v963_v21 = vpop.f32.mrf.mxu1 }
 0x844   : > { %1188 = vrot.lane.b32.xlu1 %v963_v21, %s2087_s21 }
 0x845   : > { %v1604_v22 = vpop.f32.mrf.mxu1 }
 0x847   : > { %v966_v24 = vpop.f32.mrf.mxu1 }
 0x849   : > { %v1605_v25 = vpop.f32.mrf.mxu1 }
 0x84b   : > { %v1075_v26 = vpop.f32.mrf.mxu1 }
 0x84c   : > { %1192 = vrot.lane.b32.xlu1 %v1075_v26, %s2085_s29 }
 0x84d   : > { %v1616_v27 = vpop.f32.mrf.mxu1 }
 0x84f   : > { %v1078_v28 = vpop.f32.mrf.mxu1 }
 0x851   : > { %v1617_v29 = vpop.f32.mrf.mxu1 }
 0x853   : > { %v1181_v30 = vpop.f32.mrf.mxu1 }
 0x854   : > { %1196 = vrot.lane.b32.xlu0 %v1181_v30, %s2081_s13  ;;  %s1989_s13 = scalar_lea.vmem %s2449_s4, 128 }
 0x855   : > { %v1628_v31 = vpop.f32.mrf.mxu1  ;;  %p1990_p4 = scmp.ne.s32.totalorder %s2449_s4, %s1989_s13  ;;  %p1997_p0 = scmp.lt.s32.totalorder %s1995_s14, %s1989_s13 }
 0x857   : > { %v1184_v33 = vpop.f32.mrf.mxu1  ;;  %p1991_p3 = pnand %p1990_p4, %p2530_p1  ;;  %p1998_p2 = por %p1997_p0, %p1996_p13 }
 0x859   : > { %v1629_v34 = vpop.f32.mrf.mxu1  ;;  %p1992_p9 = pneg %p1991_p3 }
 0x85b   : > { %p1999_p7 = pnand %p1998_p2, %p1992_p9 }
 0x8b6   : > { %v1189_v35 = vpop.permute.xlu1 %1188 }
 0x8b7   : > { %v1199_v36 = vsel %vm755_vm2, %v2408_v32, %v1189_v35 }
 0x8be   : > { %v1193_v1 = vpop.permute.xlu1 %1192 }
 0x8bf   : > { %v1201_v37 = vsel %vm1200_vm6, %v1199_v36, %v1193_v1 }
 0x8c6   : > { %v1197_v38 = vpop.permute.xlu0 %1196 }
 0x8c7   : > { %v1203_v39 = vsel %vm1202_vm7, %v1201_v37, %v1197_v38 }
 0x8c8   : > { %v1204_v40 = vpack.c.bf16 %v1203_v39, %v1203_v39 }
 0x8ca   : > { %1639 = vmatmul.mubr.msk.bf16.vlgmr.msra.gmra.mxu0 %vm481_vm0, %v1204_v40 }
 0x98a   : > { %v1274_v32 = vpop.f32.mrf.mxu0 }
 0x98b   : > { %1280 = vst.msk [vmem:[%s430_s23] sm:$0xff] %vm481_vm0, %v1274_v32 }
 0x98c   : > { %v1640_v41 = vpop.f32.mrf.mxu0 }
 0x98d   : > { %2002 = shalt.err (!%p1999_p7)
}
 0x98e   : > { %s2003_s28 = scalar_lea.hbm %s2447_s16, 128  ;;  %s2007_s19 = scalar_lea.hbm %s2500_s9, 256 }
 0x98f   : > { %p2004_p6 = scmp.ne.s32.totalorder %s2447_s16, %s2003_s28  ;;  %p2008_p12 = scmp.lt.s32.totalorder %s2447_s16, %s2500_s9 }
 0x990   : > { %p2009_p5 = scmp.lt.s32.totalorder %s2007_s19, %s2003_s28 }
 0x991   : > { %p2005_p10 = pnand %p2004_p6, %p2530_p1 }
 0x992   : > { %p2010_p8 = por %p2009_p5, %p2008_p12 }
 0x993   : > { %p2006_p11 = pneg %p2005_p10 }
 0x995   : > { %p2011_p4 = pnand %p2010_p8, %p2006_p11 }
 0x997   : > { %2014 = shalt.err (!%p2011_p4)
}
 0x998   : > { %1668 = dma.vmem_to_hbm [thread:$0]  (%p2530_p1), %s2449_s4, 128, %s2447_s16, %s1282_s24   ;;  %v1277_v42 = vpop.f32.mrf.mxu0 }
 0x99a   : > { %v1641_v43 = vpop.f32.mrf.mxu0 }
 0x99b PF: > { %s1307_s20 = sand.u32 1, %s2053_s30   ;;  %p2531_p3 = scmp.ne.s32.totalorder %s2520_s18, 0 }
 0x99c   : > { %p2532_p9 = scmp.ge.s32.totalorder %s2065_s12, 2  ;;  %s1308_s23 = scalar_lea.sflag [#allocation4], %s1307_s20 }
 0x99e   : > { %p1694_p13 = pnand %p2532_p9, %p2531_p3 }
 0x9a0   : > { %p1695_p0 = pneg %p1694_p13 }
 0x9a2   : > { %2048 = dma.done.wait (%p1695_p0), %s1308_s23, 128  }
 0x9a3   : > { %2050 = vsyncadd (%p1695_p0), %s1308_s23, 4294967168  ;;  %p25_p1 = scmp.ge.s32.totalorder %s2234_s22, 4   ;;  %s2533_s30 = smov %s2057_s10 }
 0x9a4   : > { %s2534_s10 = smov %s2061_s11  ;;  %s2535_s11 = smov %s2245_s26 }
 0x9a5   : > { %s2536_s12 = smov %s2234_s22  ;;  %27 = sbr.rel (!%p25_p1) target bundleno = 13 (0xd), region = 125 }
 0x9aa   :  { %1313 = vsyncpa [#allocation3], 1 }
 0x9ab   :  { %1315 = vsyncpa [#allocation3 + $0x1], 1 }
 0x9ac   :  { %1316 = vsyncpa [#allocation6], 1 }
 0x9ad   :  { %1317 = vsyncpa [#allocation9], 1 }
 0x9ae   :  { %1318 = vsyncpa [#allocation12], 1 }
 0x9af   :  { %1319 = vsyncpa [#allocation4], 1 }
 0x9b0   :  { %1321 = vsyncpa [#allocation4 + $0x1], 1 }

</bundles_post_ra>
